<compile_context>
chip_gen: v7x
topology: tpu7x:2x2x1
jax: 0.10.0
libtpu: 0.0.40
codegen_flags: <defaults>
</compile_context>

<pallas_src>
import math

import jax
import jax.numpy as jnp
from jax.experimental import pallas as pl
from jax.experimental.pallas import tpu as pltpu

_MXU_M = 256  # full MXU row granularity on v6e/v7x; also a multiple of 128 (v5e) and 16 (bf16)


def _mlp_kernel(x_ref, w1_ref, b1_ref, w2_ref, b2_ref, o_ref):
    # NOTE: the final M block may be ragged.  Padded/garbage rows flow through the
    # matmuls but are masked on the output store, and every row is independent, so the
    # valid rows are exact.  Don't add batch-wise reductions here without masking.
    h = jnp.dot(x_ref[...], w1_ref[...], preferred_element_type=jnp.float32)
    h = jnp.maximum(h + b1_ref[...], 0.0)
    out = jnp.dot(h.astype(w2_ref.dtype), w2_ref[...],
                  preferred_element_type=jnp.float32)
    o_ref[...] = (out + b2_ref[...]).astype(o_ref.dtype)


def _round_up(x, m):
    return ((x + m - 1) // m) * m


def _vmem_capacity_bytes():
    """Physical VMEM of the current generation; conservative fallback if unavailable."""
    try:
        info = pltpu.get_tpu_info()
        cap = int(getattr(info, "vmem_capacity_bytes", 64 << 20))
    except Exception:
        cap = 64 << 20  # v7x per-TensorCore VMEM (safe everywhere)
    return max(32 << 20, min(cap, 128 << 20))


def finetune_head_forward(x, w1, b1, w2, b2, *, tile_m=2048,
                          compute_dtype=jnp.bfloat16):
    """x: (B, in_dim); w1: (in_dim, 256); b1: (1, 256); w2: (256, out_dim);
       b2: (1, out_dim).  Returns (B, out_dim) float32."""
    B, in_dim = x.shape
    hidden = w1.shape[1]
    out_dim = w2.shape[1]

    # bf16 matmul operands (MXU-native); biases / accumulation / output stay f32.
    xc = x.astype(compute_dtype)
    w1c = w1.astype(compute_dtype)
    w2c = w2.astype(compute_dtype)
    b1f = b1.astype(jnp.float32)
    b2f = b2.astype(jnp.float32)
    w_isz = jnp.dtype(compute_dtype).itemsize

    # ---- generation-aware VMEM budget ----
    vmem_cap = _vmem_capacity_bytes()
    budget = (vmem_cap * 3) // 4

    def vmem_bytes(tm):
        x_bytes = 2 * tm * in_dim * w_isz            # double-buffered x tile
        o_bytes = 2 * tm * out_dim * 4               # double-buffered f32 out tile
        h_bytes = tm * hidden * (4 + w_isz)          # f32 hidden + bf16 copy for 2nd matmul
        w_bytes = ((in_dim * hidden + hidden * out_dim) * w_isz
                   + (hidden + out_dim) * 4)         # single-buffered weights / biases
        return x_bytes + o_bytes + h_bytes + w_bytes

    # ---- M-tile selection ----
    if B <= _MXU_M:
        tm = B                                       # single full-batch block
    else:
        if B >= 2 * _MXU_M:
            # Guarantee >= 2 grid steps so ("parallel",) shards rows across both v7x TCs.
            tm = min(tile_m, _round_up(pl.cdiv(B, 2), _MXU_M))
        else:
            tm = min(tile_m, B)
        tm = _round_up(tm, _MXU_M)
        while tm > _MXU_M and vmem_bytes(tm) > budget:
            tm = _round_up(tm // 2, _MXU_M)
        if tm >= B:
            tm = B                                   # one full-dim block (always legal)
    tile_m = tm

    grid = (pl.cdiv(B, tile_m),)
    vmem_limit = int(min(vmem_cap, max(vmem_bytes(tile_m) * 5 // 4, 32 << 20)))

    weights_mode = pl.Buffered(1)  # grid-invariant operands: one buffer is enough

    out = pl.pallas_call(
        _mlp_kernel,
        out_shape=jax.ShapeDtypeStruct((B, out_dim), jnp.float32),
        grid_spec=pl.GridSpec(
            grid=grid,
            in_specs=[
                pl.BlockSpec((tile_m, in_dim), lambda i: (i, 0)),            # x tile
                pl.BlockSpec((in_dim, hidden), lambda i: (0, 0),
                             pipeline_mode=weights_mode),                    # W1
                pl.BlockSpec((1, hidden), lambda i: (0, 0),
                             pipeline_mode=weights_mode),                    # b1
                pl.BlockSpec((hidden, out_dim), lambda i: (0, 0),
                             pipeline_mode=weights_mode),                    # W2
                pl.BlockSpec((1, out_dim), lambda i: (0, 0),
                             pipeline_mode=weights_mode),                    # b2
            ],
            # Full out_dim as the last axis: no lane padding, no post-slice, no f32
            # write amplification when out_dim << 128.
            out_specs=pl.BlockSpec((tile_m, out_dim), lambda i: (i, 0)),
        ),
        compiler_params=pltpu.CompilerParams(
            dimension_semantics=("parallel",),
            vmem_limit_bytes=vmem_limit,
        ),
    )(xc, w1c, b1f, w2c, b2f)

    return out


def init_finetune_head_params(key, input_dim, output_dim, num_layers=2):
    """Deterministic init matching FinetuneHead.__init__:
       weights: xavier_normal_; biases: PyTorch Linear default U(-1/sqrt(fan_in), 1/sqrt(fan_in))."""
    hidden_dim = 256
    params = []
    prev_dim = input_dim
    for i in range(num_layers):
        next_dim = hidden_dim if i < num_layers - 1 else output_dim
        key, kw, kb = jax.random.split(key, 3)
        std = math.sqrt(2.0 / (prev_dim + next_dim))  # xavier normal
        w = jax.random.normal(kw, (prev_dim, next_dim), jnp.float32) * std  # stored (in, out)
        bound = 1.0 / math.sqrt(prev_dim)
        b = jax.random.uniform(kb, (1, next_dim), jnp.float32, -bound, bound)
        params.append((w, b))
        prev_dim = next_dim
    return params


if __name__ == "__main__":
    key = jax.random.PRNGKey(0)
    batch, input_dim, output_dim = 8, 32, 16

    k_x, k_p = jax.random.split(key)
    x = jax.random.normal(k_x, (batch, input_dim), jnp.float32)
    (w1, b1), (w2, b2) = init_finetune_head_params(k_p, input_dim, output_dim, num_layers=2)

    out = finetune_head_forward(x, w1, b1, w2, b2)
    out = jax.block_until_ready(out)
    assert out.shape == (batch, output_dim)

    # Reference with the same bf16 rounding of matmul operands (f32 accumulation).
    xr = x.astype(jnp.bfloat16).astype(jnp.float32)
    w1r = w1.astype(jnp.bfloat16).astype(jnp.float32)
    w2r = w2.astype(jnp.bfloat16).astype(jnp.float32)
    h_ref = jnp.maximum(xr @ w1r + b1, 0.0)
    ref = h_ref.astype(jnp.bfloat16).astype(jnp.float32) @ w2r + b2
    assert jnp.allclose(out, ref, atol=2e-2, rtol=2e-2), "mismatch vs reference"

    print("KERNEL_OK")
</pallas_src>

<mosaic_0001>
module attributes {stable_mosaic.version = 11 : i64} {
  func.func @_mlp_kernel(%arg0: i32, %arg1: memref<8x32xbf16, #tpu.memory_space<vmem>>, %arg2: memref<32x256xbf16, #tpu.memory_space<vmem>>, %arg3: memref<1x256xf32, #tpu.memory_space<vmem>>, %arg4: memref<256x16xbf16, #tpu.memory_space<vmem>>, %arg5: memref<1x16xf32, #tpu.memory_space<vmem>>, %arg6: memref<8x16xf32, #tpu.memory_space<vmem>>) attributes {dimension_semantics = [#tpu.dimension_semantics<parallel>], iteration_bounds = array<i64: 1>, scalar_prefetch = 0 : i64, scratch_operands = 0 : i64, tpu.core_type = #tpu.core_type<tc>, window_params = [{transform_indices = @transform_0, window_bounds = array<i64: 8, 32>}, {pipeline_mode = #tpu.pipeline_mode<synchronous>, transform_indices = @transform_1, window_bounds = array<i64: 32, 256>}, {pipeline_mode = #tpu.pipeline_mode<synchronous>, transform_indices = @transform_2, window_bounds = array<i64: 1, 256>}, {pipeline_mode = #tpu.pipeline_mode<synchronous>, transform_indices = @transform_3, window_bounds = array<i64: 256, 16>}, {pipeline_mode = #tpu.pipeline_mode<synchronous>, transform_indices = @transform_4, window_bounds = array<i64: 1, 16>}, {transform_indices = @transform_5, window_bounds = array<i64: 8, 16>}]} {
    %c0 = arith.constant 0 : index
    %c0_0 = arith.constant 0 : index
    %0 = vector.load %arg1[%c0, %c0_0] : memref<8x32xbf16, #tpu.memory_space<vmem>>, vector<8x32xbf16>
    %c0_1 = arith.constant 0 : index
    %c0_2 = arith.constant 0 : index
    %1 = vector.load %arg2[%c0_1, %c0_2] : memref<32x256xbf16, #tpu.memory_space<vmem>>, vector<32x256xbf16>
    %cst = arith.constant dense<0.000000e+00> : vector<8x256xf32>
    %2 = tpu.matmul %0, %1, %cst {dimension_numbers = #tpu.dot_dimension_numbers<[1], [0], [0], [1], [0, 0, 1, 1], [], []>} : vector<8x32xbf16>, vector<32x256xbf16>, vector<8x256xf32> -> vector<8x256xf32>
    %c0_3 = arith.constant 0 : index
    %c0_4 = arith.constant 0 : index
    %3 = vector.load %arg3[%c0_3, %c0_4] : memref<1x256xf32, #tpu.memory_space<vmem>>, vector<1x256xf32>
    %4 = vector.broadcast %3 : vector<1x256xf32> to vector<8x256xf32>
    %5 = arith.addf %2, %4 : vector<8x256xf32>
    %cst_5 = arith.constant 0.000000e+00 : f32
    %6 = vector.broadcast %cst_5 : f32 to vector<8x256xf32>
    %7 = arith.maximumf %5, %6 : vector<8x256xf32>
    %8 = arith.truncf %7 : vector<8x256xf32> to vector<8x256xbf16>
    %c0_6 = arith.constant 0 : index
    %c0_7 = arith.constant 0 : index
    %9 = vector.load %arg4[%c0_6, %c0_7] : memref<256x16xbf16, #tpu.memory_space<vmem>>, vector<256x16xbf16>
    %cst_8 = arith.constant dense<0.000000e+00> : vector<8x16xf32>
    %10 = tpu.matmul %8, %9, %cst_8 {dimension_numbers = #tpu.dot_dimension_numbers<[1], [0], [0], [1], [0, 0, 1, 1], [], []>} : vector<8x256xbf16>, vector<256x16xbf16>, vector<8x16xf32> -> vector<8x16xf32>
    %c0_9 = arith.constant 0 : index
    %c0_10 = arith.constant 0 : index
    %11 = vector.load %arg5[%c0_9, %c0_10] : memref<1x16xf32, #tpu.memory_space<vmem>>, vector<1x16xf32>
    %12 = vector.broadcast %11 : vector<1x16xf32> to vector<8x16xf32>
    %13 = arith.addf %10, %12 : vector<8x16xf32>
    %c0_11 = arith.constant 0 : index
    %c0_12 = arith.constant 0 : index
    %14 = vector.load %arg6[%c0_11, %c0_12] : memref<8x16xf32, #tpu.memory_space<vmem>>, vector<8x16xf32>
    tpu.vector_store %arg6[%c0_11, %c0_12], %13 {strides = array<i32>} : memref<8x16xf32, #tpu.memory_space<vmem>>, vector<8x16xf32>,
    return
  }
  func.func @transform_0(%arg0: i32) -> (i32, i32) {
    %c0_i32 = arith.constant 0 : i32
    %c0_i32_0 = arith.constant 0 : i32
    return %arg0, %c0_i32 : i32, i32
  }
  func.func @transform_1(%arg0: i32) -> (i32, i32) {
    %c0_i32 = arith.constant 0 : i32
    %c0_i32_0 = arith.constant 0 : i32
    %c0_i32_1 = arith.constant 0 : i32
    return %c0_i32, %c0_i32_0 : i32, i32
  }
  func.func @transform_2(%arg0: i32) -> (i32, i32) {
    %c0_i32 = arith.constant 0 : i32
    %c0_i32_0 = arith.constant 0 : i32
    %c0_i32_1 = arith.constant 0 : i32
    return %c0_i32, %c0_i32_0 : i32, i32
  }
  func.func @transform_3(%arg0: i32) -> (i32, i32) {
    %c0_i32 = arith.constant 0 : i32
    %c0_i32_0 = arith.constant 0 : i32
    %c0_i32_1 = arith.constant 0 : i32
    return %c0_i32, %c0_i32_0 : i32, i32
  }
  func.func @transform_4(%arg0: i32) -> (i32, i32) {
    %c0_i32 = arith.constant 0 : i32
    %c0_i32_0 = arith.constant 0 : i32
    %c0_i32_1 = arith.constant 0 : i32
    return %c0_i32, %c0_i32_0 : i32, i32
  }
  func.func @transform_5(%arg0: i32) -> (i32, i32) {
    %c0_i32 = arith.constant 0 : i32
    %c0_i32_0 = arith.constant 0 : i32
    return %arg0, %c0_i32 : i32, i32
  }
}

</mosaic_0001>

<bundles_post_ra>
// kernel: tpu_custom_call.1
= control target key start
LH: loop header
LB: loop body
LE: loop exit
PB: predicated region body
PF: predicated region fallthrough
CT: control target
= control target key end

     0   :  { %v391_v2 = vmov 0   ;;  %vm59_vm0 = vcmask 261120   ;;  %s504_s0 = inlined_call_operand.vmem [shape: bf16[8,32], index: 0, kind: input, shape index: {}]   ;;  %s505_s1 = inlined_call_operand.vmem [shape: bf16[32,256], index: 1, kind: input, shape index: {}]   ;;  %s506_s2 = inlined_call_operand.vmem [shape: f32[1,256], index: 2, kind: input, shape index: {}]   ;;  %s507_s3 = inlined_call_operand.vmem [shape: bf16[256,16], index: 3, kind: input, shape index: {}]   ;;  %s508_s4 = inlined_call_operand.vmem [shape: f32[1,16], index: 4, kind: input, shape index: {}]   ;;  %s509_s5 = inlined_call_operand.hbm [shape: f32[8,16], index: 5, kind: output, shape index: {}]  }
   0x1   :  { %v345_v0 = vld [vmem:[%s505_s1 + $0x4] ss:$8 sps:$4 sm:$0xff]   ;;  %v347_v1 = vld [vmem:[%s505_s1] ss:$8 sps:$4 sm:$0xff]   ;;  %95 = vmatprep.mubr.bf16.mxu0 %v391_v2  ;;  %v348_v3 = vld [vmem:[%s505_s1 + $0x14] ss:$8 sps:$4 sm:$0xff]  }
   0x2   :  { %63 = vmatprep.subr.bf16.mxu0 %v345_v0  ;;  %v350_v4 = vld [vmem:[%s505_s1 + $0x10] ss:$8 sps:$4 sm:$0xff]   ;;  %v351_v5 = vld [vmem:[%s507_s3 + $0x40] sm:$0xff]   ;;  %v353_v8 = vld [vmem:[%s507_s3 + $0x48] sm:$0xff]  }
   0x3   :  { %64 = vmatpush1.bf16.msra.mxu0 %v347_v1  ;;  %v352_v6 = vld [vmem:[%s507_s3] sm:$0xff]   ;;  %321 = vmatprep.subr.bf16.mxu1 %v351_v5  ;;  %v354_v9 = vld [vmem:[%s507_s3 + $0x8] sm:$0xff]   ;;  %v355_v10 = vld [vmem:[%s507_s3 + $0x50] sm:$0xff]  }
   0x4   :  { %65 = vmatprep.subr.bf16.mxu0 %v348_v3  ;;  %v22_v7 = vld [vmem:[%s504_s0] sm:$0xf]  ;;  %322 = vmatpush3.bf16.msra.mxu1 %v352_v6  ;;  %v356_v11 = vld [vmem:[%s507_s3 + $0x10] sm:$0xff]   ;;  %v357_v12 = vld [vmem:[%s507_s3 + $0x58] sm:$0xff]  }
   0x5   :  { %323 = vmatprep.subr.bf16.mxu1 %v353_v8  ;;  %v358_v13 = vld [vmem:[%s507_s3 + $0x18] sm:$0xff]   ;;  %v359_v14 = vld [vmem:[%s507_s3 + $0x60] sm:$0xff]  }
   0x6   :  { %v360_v15 = vld [vmem:[%s507_s3 + $0x20] sm:$0xff]  }
   0x7   :  { %66 = vmatpush1.bf16.msra.mxu0 %v350_v4 }
   0x8   :  { %324 = vmatpush3.bf16.msra.mxu1 %v354_v9 }
   0x9   :  { %325 = vmatprep.subr.bf16.mxu1 %v355_v10 }
   0xa   :  { %303 = vmatmul.mubr.msk.bf16.vlgmr.msra.gmra.mrb[0].mxu0 %vm59_vm0, %v22_v7 }
   0xc   :  { %326 = vmatpush3.bf16.msra.mxu1 %v356_v11 }
   0xd   :  { %327 = vmatprep.subr.bf16.mxu1 %v357_v12 }
  0x10   :  { %328 = vmatpush3.bf16.msra.mxu1 %v358_v13 }
  0x11   :  { %10 = vsyncpa [#allocation3], 0  ;;  %329 = vmatprep.subr.bf16.mxu1 %v359_v14  ;;  %v361_v16 = vld [vmem:[%s507_s3 + $0x68] sm:$0xff]   ;;  %v363_v18 = vld [vmem:[%s507_s3 + $0x70] sm:$0xff]   ;;  %v29_v22 = vlaneseq  ;;  %vm283_vm1 = vcmask 130048  }
  0x12   :  { %v362_v17 = vld [vmem:[%s507_s3 + $0x28] sm:$0xff]   ;;  %v364_v19 = vld [vmem:[%s507_s3 + $0x30] sm:$0xff]   ;;  %v365_v20 = vld [vmem:[%s507_s3 + $0x78] sm:$0xff]  }
  0x13   :  { %v366_v21 = vld [vmem:[%s507_s3 + $0x38] sm:$0xff]   ;;  %v30_v23 = vshrl.u32 %v29_v22, 7  ;;  %v27_v25 = vld [vmem:[%s506_s2] sm:$0x3]  ;;  %s392_s2 = smov [#allocation2]  }
  0x14   :  { %330 = vmatpush3.bf16.msra.mxu1 %v360_v15  ;;  %v304_v40 = vld [vmem:[%s508_s4] ss:$0 sm:$0xff]  ;;  %s291_s10 = sshll.u32 %s392_s2, 4  ;;  %s292_s10 = int_to_ptr.vmem [resolvable:$true] %s291_s10 }
  0x15   :  { %331 = vmatprep.subr.bf16.mxu1 %v361_v16  ;;  %v31_v24 = vsub.s32 0, %v30_v23  ;;  %v35_v26 = vsub.s32 1, %v30_v23  ;;  %s367_s11 = scalar_lea.vmem %s292_s10, 128  ;;  %p372_p1 = scmp.lt.s32.totalorder %s292_s10, %s292_s10 }
  0x16   :  { %p368_p0 = scmp.ne.s32.totalorder %s292_s10, %s367_s11  ;;  %p373_p2 = scmp.lt.s32.totalorder %s367_s11, %s367_s11 }
  0x17   :  { %v32_v27 = vrot.slane %v27_v25, %v31_v24  ;;  %v36_v28 = vrot.slane %v27_v25, %v35_v26 }
  0x18   :  { %332 = vmatpush3.bf16.msra.mxu1 %v362_v17  ;;  %p374_p3 = por %p373_p2, %p372_p1 }
  0x19   :  { %333 = vmatprep.subr.bf16.mxu1 %v363_v18 }
  0x1a   :  { %p375_p4 = pnand %p374_p3, %p368_p0 }
  0x1c   :  { %334 = vmatpush3.bf16.msra.mxu1 %v364_v19 }
  0x1d   :  { %335 = vmatprep.subr.bf16.mxu1 %v365_v20 }
  0x20   :  { %336 = vmatpush3.bf16.msra.mxu1 %v366_v21 }
  0xdd   :  { %v97_v29 = vpop.f32.mrb[0].mxu0 }
  0xde   :  { %v98_v30 = vadd.f32 %v97_v29, %v32_v27  ;;  %v99_v31 = vpop.f32.mrb[1].mxu0 }
  0xdf   :  { %v100_v32 = vadd.f32 %v99_v31, %v36_v28  ;;  %v101_v33 = vpop.f32.mrb[2].mxu0 }
  0xe0   :  { %v104_v34 = vmax.f32 %v98_v30, 0.0  ;;  %v102_v35 = vpop.f32.mrb[3].mxu0 }
  0xe1   :  { %v105_v36 = vmax.f32 %v100_v32, 0.0 }
  0xe2   :  { %v106_v38 = vpack.c.bf16 %v104_v34, %v104_v34 }
  0xe3   :  { %v107_v37 = vpack.c.bf16 %v105_v36, %v105_v36 }
  0xe5   :  { %275 = vmatprep.mubr.bf16.mxu1 %v107_v37 }
  0xe6   :  { %276 = vmatmul.mubr.bf16.vlgmr.msra.gmra.mrb[0].mxu1 %v106_v38 }
 0x1b9   :  { %v337_v39 = vpop.f32.mrb[0].mxu1 }
 0x1ba   :  { %v338_v41 = vpop.f32.mrb[1].mxu1 }
 0x1bb   :  { %v339_v42 = vadd.f32 %v338_v41, %v337_v39  ;;  %v340_v43 = vpop.f32.mrb[2].mxu1 }
 0x1bc   :  { %v341_v44 = vpop.f32.mrb[3].mxu1 }
 0x1bd   :  { %v278_v45 = vadd.f32 %v339_v42, %v304_v40 }
 0x1bf   :  { %284 = vst.msk [vmem:[#allocation2] sm:$0xff] %vm283_vm1, %v278_v45 }
 0x1c0   :  { %378 = shalt.err (!%p375_p4)
}
 0x1c1   :  { %s379_s4 = scalar_lea.hbm %s509_s5, 128 }
 0x1c2   :  { %p380_p5 = scmp.ne.s32.totalorder %s509_s5, %s379_s4  ;;  %p383_p6 = scmp.lt.u32.totalorder %s379_s4, %s509_s5 }
 0x1c4   :  { %p385_p7 = pnand %p383_p6, %p380_p5 }
 0x1c6   :  { %388 = shalt.err (!%p385_p7)
}
 0x1c7   :  { %294 = dma.vmem_to_hbm [thread:$0]  %s292_s10, 128, %s509_s5, [#allocation3]  }
 0x1c8   :  { %389 = dma.done.wait [#allocation3], 128  }
 0x1c9   :  { %390 = vsyncadd [#allocation3], 4294967168 }
 0x1ca   :  { %298 = vsyncpa [#allocation3], 1 }

</bundles_post_ra>
